<compile_context>
chip_gen: v7x
topology: tpu7x:2x2x1
jax: 0.10.0
libtpu: 0.0.40
codegen_flags: <defaults>
</compile_context>

<pallas_src>
import functools

import jax
import jax.numpy as jnp
from jax.experimental import pallas as pl
from jax.experimental.pallas import tpu as pltpu

_MIB = 1024 * 1024


def _min_sublane(dtype) -> int:
    """Minimum sublane (second-to-last dim) packing tile for the dtype."""
    itemsize = jnp.dtype(dtype).itemsize
    return {4: 8, 2: 16, 1: 32}.get(itemsize, 8)


def _vmem_capacity_bytes() -> int:
    try:
        return int(pltpu.get_tpu_info().vmem_capacity_bytes)
    except Exception:
        return 64 * _MIB  # assume the smallest generation (v7x) if unknown


def _pick_batch_tile(batch: int, dtype) -> int:
    """Batch (sublane) tile: a multiple of the dtype packing tile that divides
    B, or the full batch dim (full-extent blocks are always layout-legal)."""
    sub = _min_sublane(dtype)
    if batch <= sub:
        return batch
    for tb in (8 * sub, 4 * sub, 2 * sub, sub):
        if batch % tb == 0:
            return tb
    return batch  # awkward batch size; full dim is legal


def _pick_lane_chunk(lane_len, tb, itemsize, block_budget, batch_steps):
    """Lane chunk C: divides lane_len, multiple of 128 (or the full row),
    tb*C*itemsize <= budget when possible; prefer a total grid of >= 4 steps
    (read/write overlap + v7x dual-core), then >= 2."""
    cands = [lane_len]  # the full row is always a legal (full-extent) block
    for s in range(2, min(lane_len, 4096) + 1):
        if lane_len % s == 0 and (lane_len // s) % 128 == 0:
            cands.append(lane_len // s)
    fitting = [c for c in cands if tb * c * itemsize <= block_budget]
    # If even the smallest aligned chunk blows the budget (pathological rows),
    # take the smallest one anyway; vmem_limit is derived from the final pick.
    pool = fitting if fitting else [min(cands)]
    for want_steps in (4, 2, 1):
        ok = [c for c in pool if batch_steps * (lane_len // c) >= want_steps]
        if ok:
            return max(ok)
    return max(pool)


def _class_token_kernel(tok_ref, x_ref, o_ref, tok_buf, sems, *, tb, d, chunk):
    # tok_ref : (1, d) VMEM      class token (same block every step)
    # x_ref   : (tb, chunk) VMEM pipelined flattened patch block
    # o_ref   : (B, (N+1)*d) HBM raw output ref (memory_space=pl.ANY)
    # tok_buf : (tb, d) VMEM     scratch holding the broadcast class token
    # sems    : DMA semaphores   [0] = x copy, [1] = token copy
    b = pl.program_id(0)      # batch block
    j = pl.program_id(1)      # lane chunk within the batch block
    row0 = b * tb
    col0 = d + j * chunk      # output lane offset, shifted past the token cols

    # Stream the x chunk straight from its pipelined VMEM block into the
    # shifted output window in HBM (no vreg round-trip).
    x_cp = pltpu.make_async_copy(
        x_ref, o_ref.at[pl.ds(row0, tb), pl.ds(col0, chunk)], sems.at[0])
    x_cp.start()

    # The first lane chunk of each batch block also emits the class-token
    # columns as one small aligned (tb, d) DMA.
    @pl.when(j == 0)
    def _():
        tok_buf[...] = jnp.broadcast_to(tok_ref[...], (tb, d))
        t_cp = pltpu.make_async_copy(
            tok_buf, o_ref.at[pl.ds(row0, tb), pl.ds(0, d)], sems.at[1])
        t_cp.start()
        t_cp.wait()

    x_cp.wait()


def class_token_forward(x, class_token):
    """x: (B, N, D); class_token: (1, 1, D)  ->  (B, N+1, D)."""
    B, N, D = x.shape
    assert class_token.shape[-1] == D

    dtype = x.dtype
    itemsize = jnp.dtype(dtype).itemsize

    # Free, layout-preserving reshapes (row-major): the sequence axis lives on
    # lanes so blocks are long and contiguous in HBM.
    x_flat = x.reshape(B, N * D)
    tok2d = class_token.reshape(1, D).astype(dtype)

    tb = _pick_batch_tile(B, dtype)
    batch_steps = B // tb

    # Generation-aware per-block budget: bigger blocks on 128 MiB chips
    # (v5e/v6e), smaller on 64 MiB v7x.  x is the only double-buffered stream.
    vmem_cap = _vmem_capacity_bytes()
    block_budget = (12 if vmem_cap >= 100 * _MIB else 6) * _MIB
    chunk = _pick_lane_chunk(N * D, tb, itemsize, block_budget, batch_steps)
    lane_steps = (N * D) // chunk

    # What this kernel actually allocates (+ generous compiler-scratch slack),
    # instead of claiming the whole physical VMEM.
    vmem_needed = (2 * tb * chunk + 2 * D + tb * D) * itemsize
    vmem_limit = int(min(48 * _MIB, vmem_needed + 16 * _MIB))

    kernel = functools.partial(_class_token_kernel, tb=tb, d=D, chunk=chunk)

    out_flat = pl.pallas_call(
        kernel,
        out_shape=jax.ShapeDtypeStruct((B, (N + 1) * D), dtype),
        grid_spec=pltpu.PrefetchScalarGridSpec(
            num_scalar_prefetch=0,
            grid=(batch_steps, lane_steps),
            in_specs=[
                # class token: same (full) (1, D) block for every grid step
                pl.BlockSpec((1, D), lambda b, j: (0, 0)),
                # x: (tb, chunk) flattened patch block, auto double-buffered
                pl.BlockSpec((tb, chunk), lambda b, j: (b, j)),
            ],
            # Output stays in HBM; the kernel DMAs into it directly.
            out_specs=pl.BlockSpec(memory_space=pl.ANY),
            scratch_shapes=[
                pltpu.VMEM((tb, D), dtype),     # broadcast class-token rows
                pltpu.SemaphoreType.DMA((2,)),  # [x copy, token copy]
            ],
        ),
        compiler_params=pltpu.CompilerParams(
            dimension_semantics=("parallel", "parallel"),
            vmem_limit_bytes=vmem_limit,
            has_side_effects=True,
        ),
    )(tok2d, x_flat)

    return out_flat.reshape(B, N + 1, D)


if __name__ == "__main__":
    # Small shapes consistent with the module (batch=2, num_patches=8,
    # dim_embedding=128).  Correctness does not depend on D % 128: the big
    # copy is a DMA, not a vector store.
    B, N, D = 2, 8, 128
    key = jax.random.PRNGKey(0)
    k_tok, k_x = jax.random.split(key)

    # Deterministic "parameter" init (matches torch.randn(1, 1, dim_embedding)).
    class_token = jax.random.normal(k_tok, (1, 1, D), dtype=jnp.float32)
    x = jax.random.normal(k_x, (B, N, D), dtype=jnp.float32)

    out = jax.block_until_ready(jax.jit(class_token_forward)(x, class_token))

    # Reference check (mirrors the PyTorch forward + its in-forward assert).
    ref = jnp.concatenate([jnp.broadcast_to(class_token, (B, 1, D)), x], axis=1)
    assert out.shape == (B, N + 1, D)
    assert jnp.array_equal(out[:, 0, :], jnp.broadcast_to(class_token[0], (B, D)))
    assert jnp.array_equal(out, ref)

    print("KERNEL_OK")
</pallas_src>

<mosaic_0001>
module attributes {stable_mosaic.version = 11 : i64} {
  func.func @_class_token_kernel(%arg0: i32, %arg1: i32, %arg2: memref<1x128xf32, #tpu.memory_space<vmem>>, %arg3: memref<2x256xf32, #tpu.memory_space<vmem>>, %arg4: memref<2x1152xf32, #tpu.memory_space<any>>, %arg5: memref<2x128xf32, #tpu.memory_space<vmem>>, %arg6: memref<2x!tpu.dma_semaphore, #tpu.memory_space<semaphore_mem>>) attributes {dimension_semantics = [#tpu.dimension_semantics<parallel>, #tpu.dimension_semantics<parallel>], iteration_bounds = array<i64: 1, 4>, scalar_prefetch = 0 : i64, scratch_operands = 2 : i64, tpu.core_type = #tpu.core_type<tc>, window_params = [{pipeline_mode = #tpu.pipeline_mode<synchronous>, transform_indices = @transform_0, window_bounds = array<i64: 1, 128>}, {transform_indices = @transform_1, window_bounds = array<i64: 2, 256>}, {}]} {
    %c2_i32 = arith.constant 2 : i32
    %0 = arith.muli %arg0, %c2_i32 : i32
    %c256_i32 = arith.constant 256 : i32
    %1 = arith.muli %arg1, %c256_i32 : i32
    %c128_i32 = arith.constant 128 : i32
    %2 = arith.addi %c128_i32, %1 : i32
    %c0_i32 = arith.constant 0 : i32
    %3 = tpu.memref_slice %arg4[%0, %2] : memref<2x1152xf32, #tpu.memory_space<any>> -> memref<2x256xf32, #tpu.memory_space<any>>
    %4 = tpu.memref_slice %arg6[%c0_i32] : memref<2x!tpu.dma_semaphore, #tpu.memory_space<semaphore_mem>> -> memref<1x!tpu.dma_semaphore, #tpu.memory_space<semaphore_mem>>
    %5 = tpu.memref_squeeze %4 : memref<1x!tpu.dma_semaphore, #tpu.memory_space<semaphore_mem>> -> memref<!tpu.dma_semaphore, #tpu.memory_space<semaphore_mem>>
    tpu.enqueue_dma source(%arg3 : memref<2x256xf32, #tpu.memory_space<vmem>>) target(%3 : memref<2x256xf32, #tpu.memory_space<any>>) target_semaphore(%5 : memref<!tpu.dma_semaphore, #tpu.memory_space<semaphore_mem>>)
    %c0_i32_0 = arith.constant 0 : i32
    %6 = arith.cmpi eq, %arg1, %c0_i32_0 : i32
    %7 = arith.extui %6 : i1 to i32
    %c0_i32_1 = arith.constant 0 : i32
    %8 = arith.cmpi ne, %7, %c0_i32_1 : i32
    scf.if %8 {
      %c0 = arith.constant 0 : index
      %c0_3 = arith.constant 0 : index
      %12 = vector.load %arg2[%c0, %c0_3] : memref<1x128xf32, #tpu.memory_space<vmem>>, vector<1x128xf32>
      %13 = vector.shape_cast %12 : vector<1x128xf32> to vector<1x128xf32>
      %14 = vector.broadcast %13 : vector<1x128xf32> to vector<2x128xf32>
      %c0_4 = arith.constant 0 : index
      %c0_5 = arith.constant 0 : index
      %15 = vector.load %arg5[%c0_4, %c0_5] : memref<2x128xf32, #tpu.memory_space<vmem>>, vector<2x128xf32>
      tpu.vector_store %arg5[%c0_4, %c0_5], %14 {strides = array<i32>} : memref<2x128xf32, #tpu.memory_space<vmem>>, vector<2x128xf32>,
      %c1_i32 = arith.constant 1 : i32
      %c0_i32_6 = arith.constant 0 : i32
      %16 = tpu.memref_slice %arg4[%0, %c0_i32_6] : memref<2x1152xf32, #tpu.memory_space<any>> -> memref<2x128xf32, #tpu.memory_space<any>>
      %17 = tpu.memref_slice %arg6[%c1_i32] : memref<2x!tpu.dma_semaphore, #tpu.memory_space<semaphore_mem>> -> memref<1x!tpu.dma_semaphore, #tpu.memory_space<semaphore_mem>>
      %18 = tpu.memref_squeeze %17 : memref<1x!tpu.dma_semaphore, #tpu.memory_space<semaphore_mem>> -> memref<!tpu.dma_semaphore, #tpu.memory_space<semaphore_mem>>
      tpu.enqueue_dma source(%arg5 : memref<2x128xf32, #tpu.memory_space<vmem>>) target(%16 : memref<2x128xf32, #tpu.memory_space<any>>) target_semaphore(%18 : memref<!tpu.dma_semaphore, #tpu.memory_space<semaphore_mem>>)
      %c1_i32_7 = arith.constant 1 : i32
      %c0_i32_8 = arith.constant 0 : i32
      %19 = tpu.memref_slice %arg4[%0, %c0_i32_8] : memref<2x1152xf32, #tpu.memory_space<any>> -> memref<2x128xf32, #tpu.memory_space<any>>
      %20 = tpu.memref_slice %arg6[%c1_i32_7] : memref<2x!tpu.dma_semaphore, #tpu.memory_space<semaphore_mem>> -> memref<1x!tpu.dma_semaphore, #tpu.memory_space<semaphore_mem>>
      %21 = tpu.memref_squeeze %20 : memref<1x!tpu.dma_semaphore, #tpu.memory_space<semaphore_mem>> -> memref<!tpu.dma_semaphore, #tpu.memory_space<semaphore_mem>>
      tpu.wait_dma2 semaphore(%21 : memref<!tpu.dma_semaphore, #tpu.memory_space<semaphore_mem>>) src(%arg5 : memref<2x128xf32, #tpu.memory_space<vmem>>) dst(%19 : memref<2x128xf32, #tpu.memory_space<any>>)
    } else {
    }
    %c0_i32_2 = arith.constant 0 : i32
    %9 = tpu.memref_slice %arg4[%0, %2] : memref<2x1152xf32, #tpu.memory_space<any>> -> memref<2x256xf32, #tpu.memory_space<any>>
    %10 = tpu.memref_slice %arg6[%c0_i32_2] : memref<2x!tpu.dma_semaphore, #tpu.memory_space<semaphore_mem>> -> memref<1x!tpu.dma_semaphore, #tpu.memory_space<semaphore_mem>>
    %11 = tpu.memref_squeeze %10 : memref<1x!tpu.dma_semaphore, #tpu.memory_space<semaphore_mem>> -> memref<!tpu.dma_semaphore, #tpu.memory_space<semaphore_mem>>
    tpu.wait_dma2 semaphore(%11 : memref<!tpu.dma_semaphore, #tpu.memory_space<semaphore_mem>>) src(%arg3 : memref<2x256xf32, #tpu.memory_space<vmem>>) dst(%9 : memref<2x256xf32, #tpu.memory_space<any>>)
    return
  }
  func.func @transform_0(%arg0: i32, %arg1: i32) -> (i32, i32) {
    %c0_i32 = arith.constant 0 : i32
    %c0_i32_0 = arith.constant 0 : i32
    %c0_i32_1 = arith.constant 0 : i32
    return %c0_i32, %c0_i32_0 : i32, i32
  }
  func.func @transform_1(%arg0: i32, %arg1: i32) -> (i32, i32) {
    %c0_i32 = arith.constant 0 : i32
    return %arg0, %arg1 : i32, i32
  }
}

</mosaic_0001>

<bundles_post_ra>
// kernel: class_token_forward.1
= control target key start
LH: loop header
LB: loop body
LE: loop exit
PB: predicated region body
PF: predicated region fallthrough
CT: control target
= control target key end

     0   :  { %s348_s9 = smov 0   ;;  %s350_s10 = smov 0   ;;  %s409_s0 = inlined_call_operand.vmem [shape: f32[1,128], index: 0, kind: input, shape index: {}]   ;;  %s410_s1 = inlined_call_operand.vmem [shape: f32[2,1024], index: 1, kind: input, shape index: {}]   ;;  %s411_s2 = inlined_call_operand.hbm [shape: f32[2,1152], index: 2, kind: output, shape index: {}]  }
   0x1   :  { %s352_s11 = smov 0  }
   0x2 LB: > { %s18_s12 = sadd.s32 1, %s326_s10  ;;  %p224_p1 = scmp.lt.s32.totalorder %s330_s11, 1  ;;  %s330_s11 = sphi %s352_s11, %s12_s11   ;;  %s326_s10 = sphi %s350_s10, %s413_s10   ;;  %s322_s9 = sphi %s348_s9, %s412_s9  }
   0x3   : > { %p19_p0 = scmp.ge.s32.totalorder %s18_s12, 4  ;;  %s225_s13 = sshll.u32 (!%p224_p1), %s322_s9, 1 }
   0x4   : > { %88 = sbr.rel (%p224_p1) target bundleno = 60 (0x3c), region = 28  ;;  %s227_s14 = sshll.u32 (!%p224_p1), %s322_s9, 8 }
   0x5   : > { %s415_s12 = smov (%p19_p0, %s18_s12), 0  ;;  %p106_p2 = scmp.lt.s32.totalorder (!%p224_p1), %s225_s13, 7 }
   0x6   : > { %s115_s15 = sadd.s32 (!%p224_p1), 128, %s227_s14  ;;  %s260_s29 = sshll.u32 (!%p224_p1), %s410_s1, 4  ;;  %s261_s29 = int_to_ptr.vmem [resolvable:$false] %s260_s29 }
   0x7   : > { %s116_s16 = sshra.s32 (!%p224_p1), %s115_s15, 7  ;;  %s262_s30 = scalar_lea.vmem (!%p224_p1), %s261_s29, 256 }
   0x8   : > { %s228_s17 = sshll.u32 (!%p224_p1), %s116_s16, 5 }
   0x9   : > { %s123_s24 = scalar_lea.hbm (!%p224_p1), %s411_s2, %s228_s17 }
   0xb   : > { %s417_s13 = smov (!%p106_p2, %s225_s13), 7 }
   0xc   : > { %s226_s18 = sshll.u32 %s417_s13, 1 }
   0xd   : > { %s111_s21 = scalar_lea.vmem %s410_s1, %s226_s18 }
   0xe   : > { %s131_s25 = sshll.u32 %s111_s21, 4  ;;  %s132_s25 = int_to_ptr.vmem [resolvable:$true] %s131_s25 }
   0xf   : > { %s258_s26 = scalar_lea.vmem %s132_s25, 64  ;;  %p263_p4 = scmp.lt.s32.totalorder %s132_s25, %s261_s29 }
  0x10   : > { %p259_p3 = scmp.ne.s32.totalorder %s132_s25, %s258_s26  ;;  %p264_p5 = scmp.lt.s32.totalorder %s262_s30, %s258_s26 }
  0x12   : > { %p265_p6 = por %p264_p5, %p263_p4 }
  0x14   : > { %p266_p7 = pnand %p265_p6, %p259_p3 }
  0x16   : > { %269 = shalt.err (!%p266_p7)  }
  0x17   : > { %s270_s3 = scalar_lea.hbm %s123_s24, 64  ;;  %s272_s6 = scalar_lea.hbm %s411_s2, 288 }
  0x18   : > { %p271_p8 = scmp.ne.s32.totalorder %s123_s24, %s270_s3  ;;  %p273_p9 = scmp.lt.u32.totalorder %s123_s24, %s411_s2 }
  0x19   : > { %p274_p10 = scmp.lt.u32.totalorder %s272_s6, %s270_s3  ;;  %p276_p12 = scmp.lt.u32.totalorder %s270_s3, %s123_s24 }
  0x1b   : > { %p275_p11 = por %p274_p10, %p273_p9 }
  0x1d   : > { %p277_p13 = por %p276_p12, %p275_p11 }
  0x1f   : > { %p278_p0 = pnand %p277_p13, %p271_p8 }
  0x21   : > { %281 = shalt.err (!%p278_p0)  }
  0x22   : > { %134 = dma.vmem_to_hbm [thread:$0]  %s132_s25, 64, %s123_s24, [#allocation3] }
  0x23   : > { %p229_p1 = scmp.ne.s32.totalorder %s322_s9, 0 }
  0x24   : > { %v230_v0 = vld [vmem:[%s409_s0] ss:$0 sm:$0xff] (!%p229_p1)  ;;  %s332_s15 = smov (!%p229_p1), [#allocation2]  }
  0x25   : > { %138 = sbr.rel (%p229_p1) target bundleno = 58 (0x3a), region = 36  ;;  %146 = vst [vmem:[#allocation2] sm:$0x3] (!%p229_p1), %v230_v0  ;;  %s157_s16 = sshll.u32 (!%p229_p1), %s332_s15, 4  ;;  %s158_s16 = int_to_ptr.vmem [resolvable:$true] %s157_s16 }
  0x26   : > { %s282_s17 = scalar_lea.vmem (!%p229_p1), %s158_s16, 32  ;;  %p287_p3 = scmp.lt.s32.totalorder (!%p229_p1), %s158_s16, %s158_s16 }
  0x27   : > { %p283_p2 = scmp.ne.s32.totalorder (!%p229_p1), %s158_s16, %s282_s17  ;;  %p288_p4 = scmp.lt.s32.totalorder (!%p229_p1), %s282_s17, %s282_s17 }
  0x29   : > { %p289_p5 = por (!%p229_p1), %p288_p4, %p287_p3 }
  0x2b   : > { %p290_p6 = pnand (!%p229_p1), %p289_p5, %p283_p2 }
  0x2d   : > { %293 = shalt.err (!%p290_p6)  }
  0x2e   : > { %s294_s9 = scalar_lea.hbm %s411_s2, 32 }
  0x2f   : > { %p295_p7 = scmp.ne.s32.totalorder %s411_s2, %s294_s9  ;;  %p297_p8 = scmp.lt.u32.totalorder %s272_s6, %s294_s9 }
  0x30   : > { %p298_p9 = scmp.lt.u32.totalorder %s294_s9, %s411_s2 }
  0x32   : > { %p299_p10 = por %p298_p9, %p297_p8 }
  0x34   : > { %p300_p11 = pnand %p299_p10, %p295_p7 }
  0x36   : > { %303 = shalt.err (!%p300_p11)  }
  0x37   : > { %160 = dma.vmem_to_hbm [thread:$0]  %s158_s16, 32, %s411_s2, [#allocation3 + $0x1] }
  0x38   : > { %316 = dma.done.wait [#allocation3 + $0x1], 32 }
  0x39   : > { %317 = vsyncadd [#allocation3 + $0x1], 4294967264 }
  0x3a PF: > { %318 = dma.done.wait [#allocation3], 64 }
  0x3b   : > { %319 = vsyncadd [#allocation3], 4294967232 }
  0x3c PF: > { %s12_s11 = sadd.s32 1, %s330_s11   ;;  %s412_s9 = smov %s326_s10 }
  0x3d   : > { %p9_p12 = scmp.ge.s32.totalorder %s12_s11, 5   ;;  %s413_s10 = smov %s415_s12 }
  0x3f   :  { %11 = sbr.rel (!%p9_p12) target bundleno = 2 (0x2), region = 58 }
  0x46   :  { %169 = vsyncmov [#allocation3] }
  0x49   :  { %s170_s26 = vpop.sfrf %169 }
  0x4a   :  { %p231_p13 = scmp.ne.s32.totalorder %s170_s26, 0 }
  0x4c   :  { %174 = shalt.err (%p231_p13)  }
  0x4d   :  { %176 = vsyncmov [#allocation3 + $0x1] }
  0x50   :  { %s177_s27 = vpop.sfrf %176 }
  0x51   :  { %p232_p0 = scmp.ne.s32.totalorder %s177_s27, 0 }
  0x53   :  { %181 = shalt.err (%p232_p0)  }

</bundles_post_ra>
